<compile_context>
chip_gen: v5e
topology: v5e:2x2
jax: 0.10.0
libtpu: 0.0.40
codegen_flags: <defaults>
</compile_context>

<pallas_src>
import functools

import jax
import jax.numpy as jnp
from jax.experimental import pallas as pl
from jax.experimental.pallas import tpu as pltpu


def channel_gate_kernel(x_ref, w1_ref, b1_ref, w2_ref, b2_ref, o_ref, acc_ref,
                        *, inv_hw):
    # x_ref:   (1, C, TILE_HW) input spatial tile (input dtype)
    # acc_ref: (1, C) f32 running spatial sum (persists across the HW grid axis)
    # o_ref:   (1, C, 1) sigmoid gate for this batch row (written once, at hw == last)
    hw = pl.program_id(1)

    @pl.when(hw == 0)
    def _init():
        acc_ref[...] = jnp.zeros_like(acc_ref)

    # Partial global-average-pool: accumulate spatial sums in f32.
    x = x_ref[...].astype(jnp.float32)                 # (1, C, TILE_HW)
    acc_ref[...] += jnp.sum(x, axis=-1)                # (1, C)

    @pl.when(hw == pl.num_programs(1) - 1)
    def _finalize():
        # mean over the TRUE H*W (padding tiles contribute zeros to the sum).
        pool = acc_ref[...] * inv_hw                   # (1, C)
        # MLP: Linear(C, C//r) -> ReLU -> Linear(C//r, C).  FLOP-trivial; runs once
        # per batch row, outside the per-tile hot path.
        h = jnp.dot(pool, w1_ref[...], preferred_element_type=jnp.float32) + b1_ref[...]
        h = jnp.maximum(h, 0.0)                        # (1, C//r)
        att = jnp.dot(h, w2_ref[...], preferred_element_type=jnp.float32) + b2_ref[...]
        o_ref[...] = jax.nn.sigmoid(att)[:, :, None].astype(o_ref.dtype)


def channel_gate(x, w1, b1, w2, b2, *, max_tile_hw=1024):
    """x: (B, C, H, W) NCHW.  Returns the broadcast scale map (B, C, H, W),
    matching ChannelGate.forward (which returns the expanded sigmoid scale)."""
    B, C, H, W = x.shape
    HW = H * W

    # Lane-dense spatial tiling: TILE_HW is a multiple of 128; pad HW with zeros
    # (zero-padding does not bias the sum; we divide by the true HW).
    hw128 = ((HW + 127) // 128) * 128
    tile_hw = min(max_tile_hw, hw128)
    tile_hw = max(128, (tile_hw // 128) * 128)
    hw_padded = ((HW + tile_hw - 1) // tile_hw) * tile_hw
    n_hw = hw_padded // tile_hw

    x3 = x.reshape(B, C, HW)
    if hw_padded != HW:
        x3 = jnp.pad(x3, ((0, 0), (0, 0), (0, hw_padded - HW)))

    w1 = w1.astype(jnp.float32)
    b1 = b1.astype(jnp.float32)
    w2 = w2.astype(jnp.float32)
    b2 = b2.astype(jnp.float32)

    # VMEM budget: double-buffered x tiles dominate; cap well under v7x's 64 MiB.
    x_tile_bytes = C * tile_hw * x3.dtype.itemsize
    vmem_limit = int(min(48 * 1024 * 1024, max(8 * 1024 * 1024, 8 * x_tile_bytes)))

    kernel = functools.partial(channel_gate_kernel, inv_hw=1.0 / float(HW))

    gate = pl.pallas_call(
        kernel,
        out_shape=jax.ShapeDtypeStruct((B, C, 1), x.dtype),
        grid_spec=pltpu.PrefetchScalarGridSpec(
            num_scalar_prefetch=0,
            grid=(B, n_hw),
            in_specs=[
                pl.BlockSpec((1, C, tile_hw), lambda b, h: (b, 0, h)),  # x tile
                # Tiny params: constant block index -> fetched once, not per tile.
                pl.BlockSpec(w1.shape, lambda b, h: (0, 0)),
                pl.BlockSpec(b1.shape, lambda b, h: (0, 0)),
                pl.BlockSpec(w2.shape, lambda b, h: (0, 0)),
                pl.BlockSpec(b2.shape, lambda b, h: (0, 0)),
            ],
            out_specs=pl.BlockSpec((1, C, 1), lambda b, h: (b, 0, 0)),
            scratch_shapes=[pltpu.VMEM((1, C), jnp.float32)],
        ),
        compiler_params=pltpu.CompilerParams(
            dimension_semantics=("parallel", "arbitrary"),
            vmem_limit_bytes=vmem_limit,
        ),
    )(x3, w1, b1, w2, b2)

    # The module returns scale expanded to (B, C, H, W); do the (redundant) broadcast
    # in the wrapper instead of writing it from the kernel (halves HBM traffic, and
    # lets XLA fuse it with any downstream x * scale consumer).
    return jnp.broadcast_to(gate.reshape(B, C, 1, 1), (B, C, H, W))


def channel_gate_ref(x, w1, b1, w2, b2):
    """Plain-JAX reference mirroring the PyTorch forward."""
    B, C, H, W = x.shape
    pool = jnp.mean(x.astype(jnp.float32), axis=(2, 3))   # (B, C)
    h = jnp.maximum(pool @ w1 + b1, 0.0)
    att = h @ w2 + b2
    scale = jax.nn.sigmoid(att)
    return jnp.broadcast_to(scale[:, :, None, None], (B, C, H, W)).astype(x.dtype)


if __name__ == "__main__":
    # Small shapes consistent with the module: batch=2, channels=8, spatial=16x16,
    # reduction_ratio=4 -> hidden = 2.
    B, C, H, W = 2, 8, 16, 16
    reduction_ratio = 4
    hidden = C // reduction_ratio

    key = jax.random.PRNGKey(0)
    kx, k1, k2, k3, k4 = jax.random.split(key, 5)

    x = jax.random.normal(kx, (B, C, H, W), dtype=jnp.float32)

    # Parameters for nn.Linear(C, C//r) and nn.Linear(C//r, C), stored transposed
    # so y = x @ W + b.
    w1 = jax.random.normal(k1, (C, hidden), dtype=jnp.float32) * 0.1
    b1 = jax.random.normal(k2, (1, hidden), dtype=jnp.float32) * 0.1
    w2 = jax.random.normal(k3, (hidden, C), dtype=jnp.float32) * 0.1
    b2 = jax.random.normal(k4, (1, C), dtype=jnp.float32) * 0.1

    scale = channel_gate(x, w1, b1, w2, b2)
    scale = jax.block_until_ready(scale)

    ref = channel_gate_ref(x, w1, b1, w2, b2)
    assert scale.shape == (B, C, H, W)
    assert jnp.allclose(scale, ref, atol=1e-5, rtol=1e-5)

    print("KERNEL_OK")
</pallas_src>

<mosaic_0001>
module attributes {stable_mosaic.version = 11 : i64} {
  func.func @channel_gate_kernel(%arg0: i32, %arg1: i32, %arg2: memref<1x8x256xf32, #tpu.memory_space<vmem>>, %arg3: memref<8x2xf32, #tpu.memory_space<vmem>>, %arg4: memref<1x2xf32, #tpu.memory_space<vmem>>, %arg5: memref<2x8xf32, #tpu.memory_space<vmem>>, %arg6: memref<1x8xf32, #tpu.memory_space<vmem>>, %arg7: memref<1x8x1xf32, #tpu.memory_space<vmem>>, %arg8: memref<1x8xf32, #tpu.memory_space<vmem>>) attributes {dimension_semantics = [#tpu.dimension_semantics<parallel>, #tpu.dimension_semantics<arbitrary>], iteration_bounds = array<i64: 2, 1>, scalar_prefetch = 0 : i64, scratch_operands = 1 : i64, tpu.core_type = #tpu.core_type<tc>, window_params = [{transform_indices = @transform_0, window_bounds = array<i64: 1, 8, 256>}, {pipeline_mode = #tpu.pipeline_mode<synchronous>, transform_indices = @transform_1, window_bounds = array<i64: 8, 2>}, {pipeline_mode = #tpu.pipeline_mode<synchronous>, transform_indices = @transform_2, window_bounds = array<i64: 1, 2>}, {pipeline_mode = #tpu.pipeline_mode<synchronous>, transform_indices = @transform_3, window_bounds = array<i64: 2, 8>}, {pipeline_mode = #tpu.pipeline_mode<synchronous>, transform_indices = @transform_4, window_bounds = array<i64: 1, 8>}, {transform_indices = @transform_5, window_bounds = array<i64: 1, 8, 1>}]} {
    %c0_i32 = arith.constant 0 : i32
    %0 = arith.cmpi eq, %arg1, %c0_i32 : i32
    %1 = arith.extui %0 : i1 to i32
    %c0_i32_0 = arith.constant 0 : i32
    %2 = arith.cmpi ne, %1, %c0_i32_0 : i32
    scf.if %2 {
      %cst_9 = arith.constant 0.000000e+00 : f32
      %11 = vector.broadcast %cst_9 : f32 to vector<1x8xf32>
      %c0_10 = arith.constant 0 : index
      %c0_11 = arith.constant 0 : index
      %12 = vector.load %arg8[%c0_10, %c0_11] : memref<1x8xf32, #tpu.memory_space<vmem>>, vector<1x8xf32>
      tpu.vector_store %arg8[%c0_10, %c0_11], %11 {strides = array<i32>} : memref<1x8xf32, #tpu.memory_space<vmem>>, vector<1x8xf32>,
    } else {
    }
    %c0 = arith.constant 0 : index
    %c0_1 = arith.constant 0 : index
    %c0_2 = arith.constant 0 : index
    %3 = vector.load %arg2[%c0, %c0_1, %c0_2] : memref<1x8x256xf32, #tpu.memory_space<vmem>>, vector<1x8x256xf32>
    %c0_3 = arith.constant 0 : index
    %c0_4 = arith.constant 0 : index
    %4 = vector.load %arg8[%c0_3, %c0_4] : memref<1x8xf32, #tpu.memory_space<vmem>>, vector<1x8xf32>
    %cst = arith.constant dense<0.000000e+00> : vector<1x8xf32>
    %5 = vector.multi_reduction <add>, %3, %cst [2] : vector<1x8x256xf32> to vector<1x8xf32>
    %6 = arith.addf %4, %5 : vector<1x8xf32>
    %c0_5 = arith.constant 0 : index
    %c0_6 = arith.constant 0 : index
    %7 = vector.load %arg8[%c0_5, %c0_6] : memref<1x8xf32, #tpu.memory_space<vmem>>, vector<1x8xf32>
    tpu.vector_store %arg8[%c0_5, %c0_6], %6 {strides = array<i32>} : memref<1x8xf32, #tpu.memory_space<vmem>>, vector<1x8xf32>,
    %c0_i32_7 = arith.constant 0 : i32
    %8 = arith.cmpi eq, %arg1, %c0_i32_7 : i32
    %9 = arith.extui %8 : i1 to i32
    %c0_i32_8 = arith.constant 0 : i32
    %10 = arith.cmpi ne, %9, %c0_i32_8 : i32
    scf.if %10 {
      %c0_9 = arith.constant 0 : index
      %c0_10 = arith.constant 0 : index
      %11 = vector.load %arg8[%c0_9, %c0_10] : memref<1x8xf32, #tpu.memory_space<vmem>>, vector<1x8xf32>
      %cst_11 = arith.constant 3.906250e-03 : f32
      %12 = vector.broadcast %cst_11 : f32 to vector<1x8xf32>
      %13 = arith.mulf %11, %12 : vector<1x8xf32>
      %c0_12 = arith.constant 0 : index
      %c0_13 = arith.constant 0 : index
      %14 = vector.load %arg3[%c0_12, %c0_13] : memref<8x2xf32, #tpu.memory_space<vmem>>, vector<8x2xf32>
      %cst_14 = arith.constant dense<0.000000e+00> : vector<1x2xf32>
      %15 = tpu.matmul %13, %14, %cst_14 {dimension_numbers = #tpu.dot_dimension_numbers<[1], [0], [0], [1], [0, 0, 1, 1], [], []>} : vector<1x8xf32>, vector<8x2xf32>, vector<1x2xf32> -> vector<1x2xf32>
      %c0_15 = arith.constant 0 : index
      %c0_16 = arith.constant 0 : index
      %16 = vector.load %arg4[%c0_15, %c0_16] : memref<1x2xf32, #tpu.memory_space<vmem>>, vector<1x2xf32>
      %17 = arith.addf %15, %16 : vector<1x2xf32>
      %cst_17 = arith.constant 0.000000e+00 : f32
      %18 = vector.broadcast %cst_17 : f32 to vector<1x2xf32>
      %19 = arith.maximumf %17, %18 : vector<1x2xf32>
      %c0_18 = arith.constant 0 : index
      %c0_19 = arith.constant 0 : index
      %20 = vector.load %arg5[%c0_18, %c0_19] : memref<2x8xf32, #tpu.memory_space<vmem>>, vector<2x8xf32>
      %cst_20 = arith.constant dense<0.000000e+00> : vector<1x8xf32>
      %21 = tpu.matmul %19, %20, %cst_20 {dimension_numbers = #tpu.dot_dimension_numbers<[1], [0], [0], [1], [0, 0, 1, 1], [], []>} : vector<1x2xf32>, vector<2x8xf32>, vector<1x8xf32> -> vector<1x8xf32>
      %c0_21 = arith.constant 0 : index
      %c0_22 = arith.constant 0 : index
      %22 = vector.load %arg6[%c0_21, %c0_22] : memref<1x8xf32, #tpu.memory_space<vmem>>, vector<1x8xf32>
      %23 = arith.addf %21, %22 : vector<1x8xf32>
      %24 = arith.negf %23 : vector<1x8xf32>
      %25 = math.exp %24 : vector<1x8xf32>
      %cst_23 = arith.constant 1.000000e+00 : f32
      %26 = vector.broadcast %cst_23 : f32 to vector<1x8xf32>
      %27 = arith.addf %26, %25 : vector<1x8xf32>
      %28 = arith.divf %26, %27 : vector<1x8xf32>
      %29 = vector.shape_cast %28 : vector<1x8xf32> to vector<1x8x1xf32>
      %c0_24 = arith.constant 0 : index
      %c0_25 = arith.constant 0 : index
      %c0_26 = arith.constant 0 : index
      %30 = vector.load %arg7[%c0_24, %c0_25, %c0_26] : memref<1x8x1xf32, #tpu.memory_space<vmem>>, vector<1x8x1xf32>
      tpu.vector_store %arg7[%c0_24, %c0_25, %c0_26], %29 {strides = array<i32>} : memref<1x8x1xf32, #tpu.memory_space<vmem>>, vector<1x8x1xf32>,
    } else {
    }
    return
  }
  func.func @transform_0(%arg0: i32, %arg1: i32) -> (i32, i32, i32) {
    %c0_i32 = arith.constant 0 : i32
    %c0_i32_0 = arith.constant 0 : i32
    return %arg0, %c0_i32, %arg1 : i32, i32, i32
  }
  func.func @transform_1(%arg0: i32, %arg1: i32) -> (i32, i32) {
    %c0_i32 = arith.constant 0 : i32
    %c0_i32_0 = arith.constant 0 : i32
    %c0_i32_1 = arith.constant 0 : i32
    return %c0_i32, %c0_i32_0 : i32, i32
  }
  func.func @transform_2(%arg0: i32, %arg1: i32) -> (i32, i32) {
    %c0_i32 = arith.constant 0 : i32
    %c0_i32_0 = arith.constant 0 : i32
    %c0_i32_1 = arith.constant 0 : i32
    return %c0_i32, %c0_i32_0 : i32, i32
  }
  func.func @transform_3(%arg0: i32, %arg1: i32) -> (i32, i32) {
    %c0_i32 = arith.constant 0 : i32
    %c0_i32_0 = arith.constant 0 : i32
    %c0_i32_1 = arith.constant 0 : i32
    return %c0_i32, %c0_i32_0 : i32, i32
  }
  func.func @transform_4(%arg0: i32, %arg1: i32) -> (i32, i32) {
    %c0_i32 = arith.constant 0 : i32
    %c0_i32_0 = arith.constant 0 : i32
    %c0_i32_1 = arith.constant 0 : i32
    return %c0_i32, %c0_i32_0 : i32, i32
  }
  func.func @transform_5(%arg0: i32, %arg1: i32) -> (i32, i32, i32) {
    %c0_i32 = arith.constant 0 : i32
    %c0_i32_0 = arith.constant 0 : i32
    %c0_i32_1 = arith.constant 0 : i32
    return %arg0, %c0_i32, %c0_i32_0 : i32, i32, i32
  }
}

</mosaic_0001>

<bundles_post_ra>
// kernel: tpu_custom_call.1
= control target key start
LH: loop header
LB: loop body
LE: loop exit
PB: predicated region body
PF: predicated region fallthrough
CT: control target
= control target key end

     0   :  { %10 = vsyncpa [#allocation4], 0  ;;  %s770_s0 = inlined_call_operand.hbm [shape: f32[2,8,256], index: 0, kind: input, shape index: {}]   ;;  %s771_s1 = inlined_call_operand.vmem [shape: f32[8,2], index: 1, kind: input, shape index: {}]   ;;  %s772_s2 = inlined_call_operand.vmem [shape: f32[1,2], index: 2, kind: input, shape index: {}]   ;;  %s773_s3 = inlined_call_operand.vmem [shape: f32[2,8], index: 3, kind: input, shape index: {}]   ;;  %s774_s4 = inlined_call_operand.vmem [shape: f32[1,8], index: 4, kind: input, shape index: {}]   ;;  %s775_s5 = inlined_call_operand.vmem [shape: f32[2,8,1], index: 5, kind: output, shape index: {}]  }
   0x1   :  { %12 = vsyncpa [#allocation4 + $0x1], 0  ;;  %s668_s18 = smov 0   ;;  %s670_s19 = smov 0  }
   0x2   :  { %s672_s20 = smov 0   ;;  %s674_s21 = smov 0  }
   0x3   :  { %s676_s22 = smov 0   ;;  %s678_s23 = smov 0  }
   0x4 LB: > { %s473_s24 = sadd.s32 4294967295, %s634_s23   ;;  %s30_s25 = sadd.s32 1, %s630_s22  ;;  %s634_s23 = sphi %s678_s23, %s18_s23   ;;  %s630_s22 = sphi %s676_s22, %s782_s22   ;;  %s626_s21 = sphi %s674_s21, %s781_s21   ;;  %s622_s20 = sphi %s672_s20, %s780_s20   ;;  %s618_s19 = sphi %s670_s19, %s779_s19   ;;  %s614_s18 = sphi %s668_s18, %s778_s18  }
   0x5   : > { %p32_p0 = scmp.ge.s32.totalorder %s30_s25, 2  ;;  %s39_s26 = sadd.s32 1, %s622_s20 }
   0x6   : > { %p46_p1 = scmp.ne.s32.totalorder %s622_s20, %s618_s19  ;;  %p47_p2 = scmp.eq.s32.totalorder %s634_s23, 0 }
   0x7   : > { %s784_s25 = smov (%p32_p0, %s30_s25), 0  ;;  %p52_p4 = scmp.ne.s32.totalorder %s618_s19, %s614_s18 }
   0x8   : > { %p704_p3 = por %p47_p2, %p46_p1  ;;  %s34_s28 = ssub.s32 %s630_s22, %s784_s25 }
   0x9   : > { %p53_p5 = scmp.eq.s32.totalorder %s473_s24, 0  ;;  %p37_p6 = scmp.eq.s32.totalorder %s34_s28, 0 }
   0xa   : > { %p496_p8 = scmp.lt.s32.totalorder %s634_s23, 2  ;;  %s198_s6 = sand.u32 1, %s622_s20  }
   0xb   : > { %p711_p7 = por %p53_p5, %p52_p4  ;;  %s489_s7 = sshll.u32 %s630_s22, 4 }
   0xc   : > { %s717_s30 = scalar_select %p37_p6, %s622_s20, %s39_s26  }
   0xd   : > { %s477_s8 = sshll.u32 %s198_s6, 4  ;;  %s209_s11 = scalar_lea.hbm %s770_s0, %s489_s7 }
   0xe   : > { %s211_s12 = sshll.u32 %s209_s11, 4  ;;  %s202_s13 = scalar_lea.vmem [#allocation3], %s477_s8  ;;  %s212_s12 = int_to_ptr.hbm [resolvable:$true] %s211_s12 }
   0xf   : > { %s213_s14 = sshll.u32 %s202_s13, 4  ;;  %p493_p9 = pnand %p496_p8, %p704_p3  ;;  %s214_s14 = int_to_ptr.vmem [resolvable:$true] %s213_s14 }
  0x10   : > { %p480_p10 = scmp.ge.s32.totalorder %s634_s23, 1  ;;  %p218_p11 = scmp.lt.s32.totalorder %s634_s23, 3 }
  0x11   : > { %s199_s15 = scalar_lea.sflag [#allocation4], %s198_s6 }
  0x12   : > { %495 = dma.hbm_to_vmem [thread:$0]  (!%p493_p9), %s212_s12, 256, %s214_s14, %s199_s15  }
  0x13   : > { %p219_p12 = pnand %p480_p10, %p218_p11 }
  0x14   : > { %s224_s16 = sand.u32 (!%p219_p12), 1, %s618_s19  }
  0x15   : > { %222 = sbr.rel (%p219_p12) target bundleno = 696 (0x2b8), region = 40  ;;  %s481_s17 = sshll.u32 (!%p219_p12), %s224_s16, 4 }
  0x16   : > { %s225_s18 = scalar_lea.sflag (!%p219_p12), [#allocation4], %s224_s16  ;;  %s228_s24 = scalar_lea.vmem (!%p219_p12), [#allocation3], %s481_s17 }
  0x1a   : > { %609 = dma.done.wait (%p711_p7), %s225_s18, 256  }
  0x1b   : > { %611 = vsyncadd (%p711_p7), %s225_s18, 4294967040  ;;  %v266_v0 = vld [vmem:[%s228_s24] sm:$0xff]  ;;  %v267_v1 = vld [vmem:[%s228_s24 + $0x8] sm:$0xff]  ;;  %v636_v3 = vmov 0   ;;  %vm264_vm0 = vcmask 57344   ;;  %v637_v4 = vmov 0.0   ;;  %v300_v16 = vlaneseq }
  0x1c   : > { %v269_v2 = vadd.f32 %v267_v1, %v266_v0  ;;  %547 = vset.pattern.permute.xlu0 %v636_v3  ;;  %265 = vst.msk [vmem:[#allocation2] sm:$0x1] %vm264_vm0, %v637_v4  ;;  %v312_v15 = vld [vmem:[%s771_s1] sm:$0xff]  ;;  %vm314_vm1 = vcmask 64512   ;;  %vm345_vm2 = vcmask 1041408   ;;  %vm341_vm3 = vcmask 15360  }
  0x1d   : > { %333 = vmatpush.msra.mxu0 %v312_v15  ;;  %v301_v17 = vand.u32 127, %v300_v16  ;;  %v339_v24 = vld [vmem:[%s773_s3] sm:$0x3]  ;;  %v390_v29 = vshrl.u32 %v300_v16, 7  ;;  %p256_p13 = scmp.lt.s32.totalorder %s626_s21, 1  ;;  %vm395_vm8 = vcmask 7168  }
  0x1e   : > { %270 = vadd.xlane.f32.xlu0 %v269_v2  ;;  %484 = vmatpush.msk.msra.mxu1 %vm345_vm2, %v339_v24  ;;  %v313_v25 = vld [vmem:[%s772_s2] sm:$0x1] }
  0x1f   : > { %548 = vset.pattern.permute.xlu1 %v390_v29  ;;  %v340_v30 = vld [vmem:[%s774_s4] sm:$0x1]  ;;  %s786_s21 = smov (!%p256_p13, %s626_s21), 1 }
  0x20   : > { %s482_s10 = sshll.u32 %s786_s21, 3 }
  0x21   : > { %s259_s13 = scalar_lea.vmem %s775_s5, %s482_s10 }
  0x23   : > { %v268_v19 = vld [vmem:[#allocation2] sm:$0x1] }
  0x91   : > { %v271_v5 = vpop.xlane.xlu0 %270 }
  0x92   : > { %v273_v6 = vperm.slane %v271_v5, 0  ;;  %v274_v7 = vperm.slane %v271_v5, 1  ;;  %v275_v8 = vperm.slane %v271_v5, 2  ;;  %v276_v9 = vperm.slane %v271_v5, 3 }
  0x93   : > { %v277_v10 = vperm.slane %v271_v5, 4  ;;  %v278_v11 = vperm.slane %v271_v5, 5  ;;  %v279_v12 = vperm.slane %v271_v5, 6  ;;  %v280_v13 = vperm.slane %v271_v5, 7 }
  0x94   : > { %281 = vst [vmem:[#allocation1] ss:$9 sm:$0xff] %v273_v6 }
  0x95   : > { %283 = vst [vmem:[#allocation1 + $0x1] ss:$9 sm:$0xff] %v274_v7 }
  0x96   : > { %285 = vst [vmem:[#allocation1 + $0x2] ss:$9 sm:$0xff] %v275_v8 }
  0x97   : > { %287 = vst [vmem:[#allocation1 + $0x3] ss:$9 sm:$0xff] %v276_v9 }
  0x98   : > { %289 = vst [vmem:[#allocation1 + $0x4] ss:$9 sm:$0xff] %v277_v10 }
  0x99   : > { %291 = vst [vmem:[#allocation1 + $0x5] ss:$9 sm:$0xff] %v278_v11 }
  0x9a   : > { %293 = vst [vmem:[#allocation1 + $0x6] ss:$9 sm:$0xff] %v279_v12 }
  0x9b   : > { %295 = vst [vmem:[#allocation1 + $0x7] ss:$9 sm:$0xff] %v280_v13 }
  0xa2   : > { %v296_v14 = vld [vmem:[#allocation1] sm:$0xff] }
  0xa3   : > { %298 = vperm.xlu0 %547, %v296_v14  }
  0xab   : > { %549 = vset.pattern.permute.xlu0 %v390_v29 }
 0x115   : > { %v299_v18 = vpop.permute.xlu0 %298 }
 0x116   : > { %v302_v20 = vperm.slane %v299_v18, %v301_v17 }
 0x118   : > { %v304_v21 = vadd.f32 %v302_v20, %v268_v19 }
 0x11a   : > { %306 = vst.msk [vmem:[#allocation2] sm:$0x1] %vm264_vm0, %v304_v21 }
 0x121   : > { %v310_v22 = vld [vmem:[#allocation2] sm:$0x1] }
 0x122   : > { %v311_v23 = vmul.f32 0.00390625, %v310_v22 }
 0x124   : > { %483 = vmatmul.msk.f32.vlgmr.msra.gmra.mxu0 %vm314_vm1, %v311_v23 }
 0x1a1   : > { %v335_v26 = vpop.f32.mrf.mxu0 }
 0x1a2   : > { %v336_v27 = vadd.f32 %v335_v26, %v313_v25 }
 0x1a4   : > { %v338_v28 = vmax.f32 %v336_v27, 0.0 }
 0x1a6   : > { %485 = vmatmul.msk.f32.vlgmr.msra.gmra.mxu1 %vm341_vm3, %v338_v28 }
 0x223   : > { %v366_v31 = vpop.f32.mrf.mxu1 }
 0x224   : > { %v367_v32 = vadd.f32 %v366_v31, %v340_v30 }
 0x226   : > { %v486_v33 = vmul.f32 -1.442695, %v367_v32 }
 0x228   : > { %550 = vpow2.f32 %v486_v33 }
 0x22e   : > { %v551_v34 = vpop.eup %550 }
 0x22f   : > { %v372_v35 = vadd.f32 1.0, %v551_v34 }
 0x231   : > { %552 = vrcp.f32 %v372_v35  ;;  %v384_v39 = vand.u32 2147483648, %v372_v35  ;;  %v382_v41 = vand.u32 2147483647, %v372_v35  ;;  %vm378_vm5 = vweird.f32 %v372_v35 }
 0x233   : > { %v385_v43 = vor.u32 1.1754944e-38, %v384_v39  ;;  %vm383_vm7 = vcmp.eq.f32.partialorder %v382_v41, 8.507059e+37 }
 0x237   : > { %v553_v36 = vpop.eup %552 }
 0x238   : > { %v374_v37 = vmul.f32 %v553_v36, %v372_v35  ;;  %vm379_vm4 = vweird.f32 %v553_v36 }
 0x239   : > { %vm380_vm6 = vmor %vm378_vm5, %vm379_vm4 }
 0x23a   : > { %v375_v38 = vsub.f32 1.0, %v374_v37 }
 0x23c   : > { %v376_v40 = vmul.f32 %v553_v36, %v375_v38 }
 0x23e   : > { %v377_v42 = vadd.f32 %v553_v36, %v376_v40 }
 0x240   : > { %v381_v44 = vsel %vm380_vm6, %v553_v36, %v377_v42 }
 0x241   : > { %v386_v45 = vsel %vm383_vm7, %v385_v43, %v381_v44 }
 0x242   : > { %v388_v46 = vperm.slane %v386_v45, 0 }
 0x244   : > { %393 = vperm.xlu1 %548, %v388_v46  }
 0x2b6   : > { %v394_v47 = vpop.permute.xlu1 %393 }
 0x2b7   : > { %396 = vst.msk [vmem:[%s259_s13] sm:$0xff] %vm395_vm8, %v394_v47 }
 0x2b8 PF: > { %s18_s23 = sadd.s32 1, %s634_s23   ;;  %s778_s18 = smov %s618_s19 }
 0x2b9   : > { %p15_p0 = scmp.ge.s32.totalorder %s18_s23, 4   ;;  %s779_s19 = smov %s622_s20 }
 0x2ba   : > { %s780_s20 = smov %s717_s30  ;;  %s781_s21 = smov %s630_s22 }
 0x2bb   : > { %s782_s22 = smov %s784_s25  ;;  %17 = sbr.rel (!%p15_p0) target bundleno = 4 (0x4), region = 95 }
 0x2c0   :  { %416 = vsyncpa [#allocation4], 1 }
 0x2c1   :  { %418 = vsyncpa [#allocation4 + $0x1], 1 }

</bundles_post_ra>
